<compile_context>
chip_gen: v7x
topology: tpu7x:2x2x1
jax: 0.10.0
libtpu: 0.0.40
codegen_flags: <defaults>
</compile_context>

<pallas_src>
import functools
import math

import jax
import jax.numpy as jnp
import numpy as np
from jax.experimental import pallas as pl
from jax.experimental.pallas import tpu as pltpu


def _mha_kernel(x_ref, mask_ref, wqkv_ref, bqkv_ref, wout_ref, bout_ref, o_ref,
                *, num_head, head_dim, compute_dtype, approx_recip, head_merge):
    """Fused MHA for one block of `Bb` batch elements.

    x_ref    : (Bb, S, D)    VMEM, compute dtype (bf16 or f32)
    mask_ref : (1|Bb, S, S)  VMEM, f32 additive mask (shared or per-batch)
    wqkv_ref : (D, 3D)       VMEM, compute dtype (pre-transposed, Q cols pre-scaled)
    bqkv_ref : (1, 3D)       VMEM, f32 (Q entries pre-scaled)
    wout_ref : (D, D)        VMEM, compute dtype (pre-transposed)
    bout_ref : (1, D)        VMEM, f32
    o_ref    : (Bb, S, D)    VMEM, output dtype
    """
    Bb, S, D = x_ref.shape
    H, hd = num_head, head_dim
    cdtype = compute_dtype

    # ---- fused QKV projection ------------------------------------------------
    # (Bb, S, D) -> (Bb*S, D) is a leading-dim merge only (free for S % 8 == 0);
    # the projection matmul M dim is Bb*S, so batching the grid widens MXU work.
    x2 = x_ref[...].reshape(Bb * S, D)
    qkv = jnp.dot(x2, wqkv_ref[...], preferred_element_type=jnp.float32)
    qkv = (qkv + bqkv_ref[...]).astype(cdtype)                     # (Bb*S, 3D)
    qkv = qkv.reshape(Bb, S, 3 * D)                                # leading split

    mask = mask_ref[...]                                           # (1|Bb, S, S)

    # ---- per-head attention ----------------------------------------------------
    # Heads are static value-space lane slices of the QKV activation: no scratch
    # buffer, no narrow masked stores, no VMEM reload. The score einsum contracts
    # the last dim of both operands, so K is never transposed.
    if head_merge == "accumulate":
        out_acc = jnp.zeros((Bb * S, D), jnp.float32)
    head_outs = []
    for h in range(H):
        q_h = qkv[:, :, h * hd:(h + 1) * hd]                       # (Bb, S, hd)
        k_h = qkv[:, :, D + h * hd:D + (h + 1) * hd]
        v_h = qkv[:, :, 2 * D + h * hd:2 * D + (h + 1) * hd]

        # 1/sqrt(hd) is already folded into the Q columns of Wqkv / bqkv.
        s = jnp.einsum("bqd,bkd->bqk", q_h, k_h,
                       preferred_element_type=jnp.float32)         # (Bb, S, S)
        s = s + mask                                               # additive float mask

        m = jnp.max(s, axis=-1, keepdims=True)
        p = jnp.exp(s - m)
        denom = jnp.sum(p, axis=-1, keepdims=True)
        p = p * pl.reciprocal(denom, approx=approx_recip)

        o_h = jnp.einsum("bqk,bkd->bqd", p.astype(cdtype), v_h,
                         preferred_element_type=jnp.float32)       # (Bb, S, hd)

        if head_merge == "accumulate":
            # Head merge folded into the output projection: each head hits its
            # own hd-row slice of Wout and accumulates in f32. No relayout at
            # all (no lane-concat, no masked stores), at the cost of a
            # narrower (K=hd) contraction per matmul.
            o2 = o_h.astype(cdtype).reshape(Bb * S, hd)
            out_acc = out_acc + jnp.dot(o2, wout_ref[h * hd:(h + 1) * hd, :],
                                        preferred_element_type=jnp.float32)
        else:
            head_outs.append(o_h.astype(cdtype))

    # ---- head merge + output projection ---------------------------------------
    if head_merge == "concat":
        # Single value-space relayout feeding one full-width (K=D) projection.
        attn = jnp.concatenate(head_outs, axis=-1).reshape(Bb * S, D)
        out_acc = jnp.dot(attn, wout_ref[...], preferred_element_type=jnp.float32)

    out = out_acc + bout_ref[...]
    o_ref[...] = out.reshape(Bb, S, D).astype(o_ref.dtype)


def _vmem_bytes(block_b, S, D, H, cb, ob, mask_rows):
    """Rough VMEM working-set estimate (pipeline buffers + live values)."""
    # Default double-buffered pipeline blocks.
    bufs = (2 * block_b * S * D * cb          # x blocks
            + 2 * block_b * S * D * ob        # out blocks
            + 2 * mask_rows * S * S * 4       # mask blocks
            + 2 * (3 * D * D + D * D) * cb    # Wqkv^T + Wout^T blocks
            + 2 * 4 * D * 4)                  # bias blocks
    # Live in-kernel values, incl. f32 scores/probs (Mosaic internal scratch).
    live = (block_b * S * 3 * D * cb          # qkv activation
            + 4 * block_b * S * S * 4         # f32 scores + probs (+ slack)
            + 2 * block_b * S * D * cb        # per-head outputs / merged heads
            + 2 * block_b * S * D * 4)        # f32 projection accumulators
    return bufs + live


def multi_head_attention(x, attn_mask, params, num_head, *,
                         compute_dtype=jnp.bfloat16, approx_recip=True,
                         head_merge="accumulate", max_block_b=None):
    """x: [B, S, D]; attn_mask: [S,S] / [1,S,S] (shared) / [B,S,S] additive float mask."""
    assert head_merge in ("accumulate", "concat")
    B, S, D = x.shape
    assert D % num_head == 0
    head_dim = D // num_head
    out_dtype = x.dtype

    if attn_mask.ndim == 2:
        attn_mask = attn_mask[None]
    mask_b = attn_mask.shape[0]
    assert mask_b in (1, B), "attn_mask batch dim must be 1 (shared) or B"
    attn_mask = attn_mask.astype(jnp.float32)
    per_batch_mask = mask_b == B

    # nn.Linear weight is (out, in); pre-transpose so the kernel does x @ W.
    # Fold the SDPA 1/sqrt(head_dim) scale into the Q columns of Wqkv and the
    # Q entries of bqkv (wrapper-side; fuses with the transpose/cast), so the
    # kernel never does the (S,S)-sized scale multiply.
    scale = 1.0 / math.sqrt(head_dim)
    qkv_scale = jnp.concatenate(
        [jnp.full((D,), scale, jnp.float32), jnp.ones((2 * D,), jnp.float32)])
    wqkv = (params["wqkv"].T * qkv_scale[None, :]).astype(compute_dtype)   # (D, 3D)
    bqkv = (params["bqkv"] * qkv_scale).reshape(1, 3 * D).astype(jnp.float32)
    wout = params["wout"].T.astype(compute_dtype)                          # (D, D)
    bout = params["bout"].reshape(1, D).astype(jnp.float32)
    x_c = x.astype(compute_dtype)

    # VMEM budget: cap at the device's physical VMEM (64 MiB on v7x, 128 MiB on
    # v5e/v6e) with headroom, not an unbounded 2x estimate.
    try:
        vmem_cap = int(pltpu.get_tpu_info().vmem_capacity_bytes)
    except Exception:  # pragma: no cover - conservative default (v7x size)
        vmem_cap = 64 * 1024 * 1024
    cap = int(0.8 * vmem_cap)

    # Batch-block size: process as many batch elements per grid step as fit,
    # amortizing the ~0.35us/step pipeline overhead and growing the projection
    # matmul M dim (Bb*S) toward MXU-friendly (>=256) sizes.
    cb = jnp.dtype(compute_dtype).itemsize
    ob = jnp.dtype(out_dtype).itemsize
    limit_b = B if max_block_b is None else max(1, min(B, max_block_b))
    block_b = 1
    for cand in range(limit_b, 0, -1):
        if B % cand:
            continue
        rows = cand if per_batch_mask else 1
        if int(1.25 * _vmem_bytes(cand, S, D, num_head, cb, ob, rows)) <= cap:
            block_b = cand
            break

    mask_rows = block_b if per_batch_mask else 1
    est = _vmem_bytes(block_b, S, D, num_head, cb, ob, mask_rows)
    vmem_limit = int(max(32 * 1024 * 1024, min(cap, 2 * est)))

    if per_batch_mask:
        mask_spec = pl.BlockSpec((block_b, S, S), lambda b: (b, 0, 0))
    else:
        # Shared mask -> every grid step reuses block 0 (fetched once).
        mask_spec = pl.BlockSpec((1, S, S), lambda b: (0, 0, 0))

    kernel = functools.partial(
        _mha_kernel, num_head=num_head, head_dim=head_dim,
        compute_dtype=compute_dtype, approx_recip=approx_recip,
        head_merge=head_merge)

    return pl.pallas_call(
        kernel,
        out_shape=jax.ShapeDtypeStruct((B, S, D), out_dtype),
        grid_spec=pltpu.PrefetchScalarGridSpec(
            num_scalar_prefetch=0,
            grid=(B // block_b,),
            in_specs=[
                pl.BlockSpec((block_b, S, D), lambda b: (b, 0, 0)),   # x
                mask_spec,                                            # additive mask
                pl.BlockSpec((D, 3 * D), lambda b: (0, 0)),           # Wqkv^T (Q cols pre-scaled)
                pl.BlockSpec((1, 3 * D), lambda b: (0, 0)),           # bqkv
                pl.BlockSpec((D, D), lambda b: (0, 0)),               # Wout^T
                pl.BlockSpec((1, D), lambda b: (0, 0)),               # bout
            ],
            out_specs=pl.BlockSpec((block_b, S, D), lambda b: (b, 0, 0)),
        ),
        compiler_params=pltpu.CompilerParams(
            dimension_semantics=("parallel",),
            vmem_limit_bytes=vmem_limit),
    )(x_c, attn_mask, wqkv, bqkv, wout, bout)


def _reference_mha(x, attn_mask, params, num_head):
    """Pure-JAX reference mirroring the PyTorch forward (f32)."""
    B, S, D = x.shape
    hd = D // num_head
    if attn_mask.ndim == 2:
        attn_mask = attn_mask[None]
    qkv = x @ params["wqkv"].T + params["bqkv"]                        # (B, S, 3D)
    qkv = qkv.reshape(B, S, 3, num_head, hd).transpose(0, 2, 3, 1, 4)  # b k h t d
    q, k, v = qkv[:, 0], qkv[:, 1], qkv[:, 2]
    s = jnp.einsum("bhqd,bhkd->bhqk", q, k) / jnp.sqrt(hd)
    s = s + attn_mask[:, None, :, :]
    p = jax.nn.softmax(s, axis=-1)
    o = jnp.einsum("bhqk,bhkd->bhqd", p, v)
    o = o.transpose(0, 2, 1, 3).reshape(B, S, D)
    return o @ params["wout"].T + params["bout"]


if __name__ == "__main__":
    B, S, D, H = 2, 8, 32, 4

    key = jax.random.PRNGKey(0)
    kx, kw1, kb1, kw2, kb2 = jax.random.split(key, 5)

    x = jax.random.normal(kx, (B, S, D), dtype=jnp.float32)

    # Deterministic parameter init (trunc_normal-ish scale; synthetic weights).
    params = {
        "wqkv": 0.02 * jax.random.normal(kw1, (3 * D, D), dtype=jnp.float32),
        "bqkv": 0.01 * jax.random.normal(kb1, (3 * D,), dtype=jnp.float32),
        "wout": 0.02 * jax.random.normal(kw2, (D, D), dtype=jnp.float32),
        "bout": 0.01 * jax.random.normal(kb2, (D,), dtype=jnp.float32),
    }

    # Shared (batch-broadcast) causal additive float mask: (1, S, S).
    causal = jnp.tril(jnp.ones((S, S), dtype=bool))
    shared_mask = jnp.where(causal, 0.0, -1e9).astype(jnp.float32)[None]

    ref = _reference_mha(x, shared_mask, params, H)

    # Strict-precision path (f32 MXU operands, exact reciprocal).
    out_f32 = multi_head_attention(x, shared_mask, params, H,
                                   compute_dtype=jnp.float32,
                                   approx_recip=False)
    jax.block_until_ready(out_f32)
    np.testing.assert_allclose(np.asarray(out_f32), np.asarray(ref),
                               rtol=1e-4, atol=1e-5)

    # Fast path (bf16 MXU operands with f32 accumulation, EUP approx recip).
    out_bf16 = multi_head_attention(x, shared_mask, params, H,
                                    compute_dtype=jnp.bfloat16,
                                    approx_recip=True)
    jax.block_until_ready(out_bf16)
    np.testing.assert_allclose(np.asarray(out_bf16), np.asarray(ref),
                               rtol=5e-2, atol=5e-3)

    # Per-batch additive mask path ([B, S, S]): causal for batch 0, none for 1.
    batch_mask = jnp.stack([shared_mask[0], jnp.zeros((S, S), jnp.float32)])
    ref_b = _reference_mha(x, batch_mask, params, H)
    out_b = multi_head_attention(x, batch_mask, params, H,
                                 compute_dtype=jnp.float32,
                                 approx_recip=False)
    jax.block_until_ready(out_b)
    np.testing.assert_allclose(np.asarray(out_b), np.asarray(ref_b),
                               rtol=1e-4, atol=1e-5)

    print("KERNEL_OK")
</pallas_src>

<mosaic_0001>
module attributes {stable_mosaic.version = 11 : i64} {
  func.func @_mha_kernel(%arg0: i32, %arg1: memref<2x8x32xf32, #tpu.memory_space<vmem>>, %arg2: memref<1x8x8xf32, #tpu.memory_space<vmem>>, %arg3: memref<32x96xf32, #tpu.memory_space<vmem>>, %arg4: memref<1x96xf32, #tpu.memory_space<vmem>>, %arg5: memref<32x32xf32, #tpu.memory_space<vmem>>, %arg6: memref<1x32xf32, #tpu.memory_space<vmem>>, %arg7: memref<2x8x32xf32, #tpu.memory_space<vmem>>) attributes {dimension_semantics = [#tpu.dimension_semantics<parallel>], iteration_bounds = array<i64: 1>, scalar_prefetch = 0 : i64, scratch_operands = 0 : i64, tpu.core_type = #tpu.core_type<tc>, window_params = [{transform_indices = @transform_0, window_bounds = array<i64: 2, 8, 32>}, {pipeline_mode = #tpu.pipeline_mode<synchronous>, transform_indices = @transform_1, window_bounds = array<i64: 1, 8, 8>}, {pipeline_mode = #tpu.pipeline_mode<synchronous>, transform_indices = @transform_2, window_bounds = array<i64: 32, 96>}, {pipeline_mode = #tpu.pipeline_mode<synchronous>, transform_indices = @transform_3, window_bounds = array<i64: 1, 96>}, {pipeline_mode = #tpu.pipeline_mode<synchronous>, transform_indices = @transform_4, window_bounds = array<i64: 32, 32>}, {pipeline_mode = #tpu.pipeline_mode<synchronous>, transform_indices = @transform_5, window_bounds = array<i64: 1, 32>}, {transform_indices = @transform_6, window_bounds = array<i64: 2, 8, 32>}]} {
    %c0 = arith.constant 0 : index
    %c0_0 = arith.constant 0 : index
    %c0_1 = arith.constant 0 : index
    %0 = vector.load %arg1[%c0, %c0_0, %c0_1] : memref<2x8x32xf32, #tpu.memory_space<vmem>>, vector<2x8x32xf32>
    %1 = vector.shape_cast %0 : vector<2x8x32xf32> to vector<16x32xf32>
    %c0_2 = arith.constant 0 : index
    %c0_3 = arith.constant 0 : index
    %2 = vector.load %arg3[%c0_2, %c0_3] : memref<32x96xf32, #tpu.memory_space<vmem>>, vector<32x96xf32>
    %cst = arith.constant dense<0.000000e+00> : vector<16x96xf32>
    %3 = tpu.matmul %1, %2, %cst {dimension_numbers = #tpu.dot_dimension_numbers<[1], [0], [0], [1], [0, 0, 1, 1], [], []>} : vector<16x32xf32>, vector<32x96xf32>, vector<16x96xf32> -> vector<16x96xf32>
    %c0_4 = arith.constant 0 : index
    %c0_5 = arith.constant 0 : index
    %4 = vector.load %arg4[%c0_4, %c0_5] : memref<1x96xf32, #tpu.memory_space<vmem>>, vector<1x96xf32>
    %5 = vector.broadcast %4 : vector<1x96xf32> to vector<16x96xf32>
    %6 = arith.addf %3, %5 : vector<16x96xf32>
    %7 = vector.shape_cast %6 : vector<16x96xf32> to vector<2x8x96xf32>
    %c0_6 = arith.constant 0 : index
    %c0_7 = arith.constant 0 : index
    %c0_8 = arith.constant 0 : index
    %8 = vector.load %arg2[%c0_6, %c0_7, %c0_8] : memref<1x8x8xf32, #tpu.memory_space<vmem>>, vector<1x8x8xf32>
    %cst_9 = arith.constant 0.000000e+00 : f32
    %9 = vector.broadcast %cst_9 : f32 to vector<16x32xf32>
    %10 = vector.extract_strided_slice %7 {offsets = [0, 0, 0], sizes = [2, 8, 8], strides = [1, 1, 1]} : vector<2x8x96xf32> to vector<2x8x8xf32>
    %11 = vector.extract_strided_slice %7 {offsets = [0, 0, 32], sizes = [2, 8, 8], strides = [1, 1, 1]} : vector<2x8x96xf32> to vector<2x8x8xf32>
    %12 = vector.extract_strided_slice %7 {offsets = [0, 0, 64], sizes = [2, 8, 8], strides = [1, 1, 1]} : vector<2x8x96xf32> to vector<2x8x8xf32>
    "tpu.trace_start"() <{level = 10 : i32, message = "bqd,bkd->bqk"}> : () -> ()
    %cst_10 = arith.constant dense<0.000000e+00> : vector<2x8x8xf32>
    %13 = tpu.matmul %10, %11, %cst_10 {dimension_numbers = #tpu.dot_dimension_numbers<[2], [2], [1], [1], [0, 0, 0, 1, 1, 1], [0], [0]>} : vector<2x8x8xf32>, vector<2x8x8xf32>, vector<2x8x8xf32> -> vector<2x8x8xf32>
    "tpu.trace_stop"() : () -> ()
    %14 = vector.broadcast %8 : vector<1x8x8xf32> to vector<2x8x8xf32>
    %15 = arith.addf %13, %14 : vector<2x8x8xf32>
    %cst_11 = arith.constant dense<0xFF800000> : vector<2x8xf32>
    %16 = vector.multi_reduction <maximumf>, %15, %cst_11 [2] : vector<2x8x8xf32> to vector<2x8xf32>
    %17 = vector.shape_cast %16 : vector<2x8xf32> to vector<2x8x1xf32>
    %18 = vector.broadcast %17 : vector<2x8x1xf32> to vector<2x8x8xf32>
    %19 = arith.subf %15, %18 : vector<2x8x8xf32>
    %20 = math.exp %19 : vector<2x8x8xf32>
    %cst_12 = arith.constant dense<0.000000e+00> : vector<2x8xf32>
    %21 = vector.multi_reduction <add>, %20, %cst_12 [2] : vector<2x8x8xf32> to vector<2x8xf32>
    %22 = vector.shape_cast %21 : vector<2x8xf32> to vector<2x8x1xf32>
    %23 = tpu.reciprocal %22 : vector<2x8x1xf32> -> vector<2x8x1xf32>
    %24 = vector.broadcast %23 : vector<2x8x1xf32> to vector<2x8x8xf32>
    %25 = arith.mulf %20, %24 : vector<2x8x8xf32>
    "tpu.trace_start"() <{level = 10 : i32, message = "bqk,bkd->bqd"}> : () -> ()
    %cst_13 = arith.constant dense<0.000000e+00> : vector<2x8x8xf32>
    %26 = tpu.matmul %25, %12, %cst_13 {dimension_numbers = #tpu.dot_dimension_numbers<[2], [1], [1], [2], [0, 0, 0, 1, 1, 2], [0], [0]>} : vector<2x8x8xf32>, vector<2x8x8xf32>, vector<2x8x8xf32> -> vector<2x8x8xf32>
    "tpu.trace_stop"() : () -> ()
    %27 = vector.shape_cast %26 : vector<2x8x8xf32> to vector<16x8xf32>
    %c0_14 = arith.constant 0 : index
    %c0_15 = arith.constant 0 : index
    %28 = vector.load %arg5[%c0_14, %c0_15] : memref<32x32xf32, #tpu.memory_space<vmem>>, vector<8x32xf32>
    %cst_16 = arith.constant dense<0.000000e+00> : vector<16x32xf32>
    %29 = tpu.matmul %27, %28, %cst_16 {dimension_numbers = #tpu.dot_dimension_numbers<[1], [0], [0], [1], [0, 0, 1, 1], [], []>} : vector<16x8xf32>, vector<8x32xf32>, vector<16x32xf32> -> vector<16x32xf32>
    %30 = arith.addf %9, %29 : vector<16x32xf32>
    %31 = vector.extract_strided_slice %7 {offsets = [0, 0, 8], sizes = [2, 8, 8], strides = [1, 1, 1]} : vector<2x8x96xf32> to vector<2x8x8xf32>
    %32 = vector.extract_strided_slice %7 {offsets = [0, 0, 40], sizes = [2, 8, 8], strides = [1, 1, 1]} : vector<2x8x96xf32> to vector<2x8x8xf32>
    %33 = vector.extract_strided_slice %7 {offsets = [0, 0, 72], sizes = [2, 8, 8], strides = [1, 1, 1]} : vector<2x8x96xf32> to vector<2x8x8xf32>
    "tpu.trace_start"() <{level = 10 : i32, message = "bqd,bkd->bqk"}> : () -> ()
    %cst_17 = arith.constant dense<0.000000e+00> : vector<2x8x8xf32>
    %34 = tpu.matmul %31, %32, %cst_17 {dimension_numbers = #tpu.dot_dimension_numbers<[2], [2], [1], [1], [0, 0, 0, 1, 1, 1], [0], [0]>} : vector<2x8x8xf32>, vector<2x8x8xf32>, vector<2x8x8xf32> -> vector<2x8x8xf32>
    "tpu.trace_stop"() : () -> ()
    %35 = vector.broadcast %8 : vector<1x8x8xf32> to vector<2x8x8xf32>
    %36 = arith.addf %34, %35 : vector<2x8x8xf32>
    %cst_18 = arith.constant dense<0xFF800000> : vector<2x8xf32>
    %37 = vector.multi_reduction <maximumf>, %36, %cst_18 [2] : vector<2x8x8xf32> to vector<2x8xf32>
    %38 = vector.shape_cast %37 : vector<2x8xf32> to vector<2x8x1xf32>
    %39 = vector.broadcast %38 : vector<2x8x1xf32> to vector<2x8x8xf32>
    %40 = arith.subf %36, %39 : vector<2x8x8xf32>
    %41 = math.exp %40 : vector<2x8x8xf32>
    %cst_19 = arith.constant dense<0.000000e+00> : vector<2x8xf32>
    %42 = vector.multi_reduction <add>, %41, %cst_19 [2] : vector<2x8x8xf32> to vector<2x8xf32>
    %43 = vector.shape_cast %42 : vector<2x8xf32> to vector<2x8x1xf32>
    %44 = tpu.reciprocal %43 : vector<2x8x1xf32> -> vector<2x8x1xf32>
    %45 = vector.broadcast %44 : vector<2x8x1xf32> to vector<2x8x8xf32>
    %46 = arith.mulf %41, %45 : vector<2x8x8xf32>
    "tpu.trace_start"() <{level = 10 : i32, message = "bqk,bkd->bqd"}> : () -> ()
    %cst_20 = arith.constant dense<0.000000e+00> : vector<2x8x8xf32>
    %47 = tpu.matmul %46, %33, %cst_20 {dimension_numbers = #tpu.dot_dimension_numbers<[2], [1], [1], [2], [0, 0, 0, 1, 1, 2], [0], [0]>} : vector<2x8x8xf32>, vector<2x8x8xf32>, vector<2x8x8xf32> -> vector<2x8x8xf32>
    "tpu.trace_stop"() : () -> ()
    %48 = vector.shape_cast %47 : vector<2x8x8xf32> to vector<16x8xf32>
    %c8 = arith.constant 8 : index
    %c0_21 = arith.constant 0 : index
    %49 = vector.load %arg5[%c8, %c0_21] : memref<32x32xf32, #tpu.memory_space<vmem>>, vector<8x32xf32>
    %cst_22 = arith.constant dense<0.000000e+00> : vector<16x32xf32>
    %50 = tpu.matmul %48, %49, %cst_22 {dimension_numbers = #tpu.dot_dimension_numbers<[1], [0], [0], [1], [0, 0, 1, 1], [], []>} : vector<16x8xf32>, vector<8x32xf32>, vector<16x32xf32> -> vector<16x32xf32>
    %51 = arith.addf %30, %50 : vector<16x32xf32>
    %52 = vector.extract_strided_slice %7 {offsets = [0, 0, 16], sizes = [2, 8, 8], strides = [1, 1, 1]} : vector<2x8x96xf32> to vector<2x8x8xf32>
    %53 = vector.extract_strided_slice %7 {offsets = [0, 0, 48], sizes = [2, 8, 8], strides = [1, 1, 1]} : vector<2x8x96xf32> to vector<2x8x8xf32>
    %54 = vector.extract_strided_slice %7 {offsets = [0, 0, 80], sizes = [2, 8, 8], strides = [1, 1, 1]} : vector<2x8x96xf32> to vector<2x8x8xf32>
    "tpu.trace_start"() <{level = 10 : i32, message = "bqd,bkd->bqk"}> : () -> ()
    %cst_23 = arith.constant dense<0.000000e+00> : vector<2x8x8xf32>
    %55 = tpu.matmul %52, %53, %cst_23 {dimension_numbers = #tpu.dot_dimension_numbers<[2], [2], [1], [1], [0, 0, 0, 1, 1, 1], [0], [0]>} : vector<2x8x8xf32>, vector<2x8x8xf32>, vector<2x8x8xf32> -> vector<2x8x8xf32>
    "tpu.trace_stop"() : () -> ()
    %56 = vector.broadcast %8 : vector<1x8x8xf32> to vector<2x8x8xf32>
    %57 = arith.addf %55, %56 : vector<2x8x8xf32>
    %cst_24 = arith.constant dense<0xFF800000> : vector<2x8xf32>
    %58 = vector.multi_reduction <maximumf>, %57, %cst_24 [2] : vector<2x8x8xf32> to vector<2x8xf32>
    %59 = vector.shape_cast %58 : vector<2x8xf32> to vector<2x8x1xf32>
    %60 = vector.broadcast %59 : vector<2x8x1xf32> to vector<2x8x8xf32>
    %61 = arith.subf %57, %60 : vector<2x8x8xf32>
    %62 = math.exp %61 : vector<2x8x8xf32>
    %cst_25 = arith.constant dense<0.000000e+00> : vector<2x8xf32>
    %63 = vector.multi_reduction <add>, %62, %cst_25 [2] : vector<2x8x8xf32> to vector<2x8xf32>
    %64 = vector.shape_cast %63 : vector<2x8xf32> to vector<2x8x1xf32>
    %65 = tpu.reciprocal %64 : vector<2x8x1xf32> -> vector<2x8x1xf32>
    %66 = vector.broadcast %65 : vector<2x8x1xf32> to vector<2x8x8xf32>
    %67 = arith.mulf %62, %66 : vector<2x8x8xf32>
    "tpu.trace_start"() <{level = 10 : i32, message = "bqk,bkd->bqd"}> : () -> ()
    %cst_26 = arith.constant dense<0.000000e+00> : vector<2x8x8xf32>
    %68 = tpu.matmul %67, %54, %cst_26 {dimension_numbers = #tpu.dot_dimension_numbers<[2], [1], [1], [2], [0, 0, 0, 1, 1, 2], [0], [0]>} : vector<2x8x8xf32>, vector<2x8x8xf32>, vector<2x8x8xf32> -> vector<2x8x8xf32>
    "tpu.trace_stop"() : () -> ()
    %69 = vector.shape_cast %68 : vector<2x8x8xf32> to vector<16x8xf32>
    %c16 = arith.constant 16 : index
    %c0_27 = arith.constant 0 : index
    %70 = vector.load %arg5[%c16, %c0_27] : memref<32x32xf32, #tpu.memory_space<vmem>>, vector<8x32xf32>
    %cst_28 = arith.constant dense<0.000000e+00> : vector<16x32xf32>
    %71 = tpu.matmul %69, %70, %cst_28 {dimension_numbers = #tpu.dot_dimension_numbers<[1], [0], [0], [1], [0, 0, 1, 1], [], []>} : vector<16x8xf32>, vector<8x32xf32>, vector<16x32xf32> -> vector<16x32xf32>
    %72 = arith.addf %51, %71 : vector<16x32xf32>
    %73 = vector.extract_strided_slice %7 {offsets = [0, 0, 24], sizes = [2, 8, 8], strides = [1, 1, 1]} : vector<2x8x96xf32> to vector<2x8x8xf32>
    %74 = vector.extract_strided_slice %7 {offsets = [0, 0, 56], sizes = [2, 8, 8], strides = [1, 1, 1]} : vector<2x8x96xf32> to vector<2x8x8xf32>
    %75 = vector.extract_strided_slice %7 {offsets = [0, 0, 88], sizes = [2, 8, 8], strides = [1, 1, 1]} : vector<2x8x96xf32> to vector<2x8x8xf32>
    "tpu.trace_start"() <{level = 10 : i32, message = "bqd,bkd->bqk"}> : () -> ()
    %cst_29 = arith.constant dense<0.000000e+00> : vector<2x8x8xf32>
    %76 = tpu.matmul %73, %74, %cst_29 {dimension_numbers = #tpu.dot_dimension_numbers<[2], [2], [1], [1], [0, 0, 0, 1, 1, 1], [0], [0]>} : vector<2x8x8xf32>, vector<2x8x8xf32>, vector<2x8x8xf32> -> vector<2x8x8xf32>
    "tpu.trace_stop"() : () -> ()
    %77 = vector.broadcast %8 : vector<1x8x8xf32> to vector<2x8x8xf32>
    %78 = arith.addf %76, %77 : vector<2x8x8xf32>
    %cst_30 = arith.constant dense<0xFF800000> : vector<2x8xf32>
    %79 = vector.multi_reduction <maximumf>, %78, %cst_30 [2] : vector<2x8x8xf32> to vector<2x8xf32>
    %80 = vector.shape_cast %79 : vector<2x8xf32> to vector<2x8x1xf32>
    %81 = vector.broadcast %80 : vector<2x8x1xf32> to vector<2x8x8xf32>
    %82 = arith.subf %78, %81 : vector<2x8x8xf32>
    %83 = math.exp %82 : vector<2x8x8xf32>
    %cst_31 = arith.constant dense<0.000000e+00> : vector<2x8xf32>
    %84 = vector.multi_reduction <add>, %83, %cst_31 [2] : vector<2x8x8xf32> to vector<2x8xf32>
    %85 = vector.shape_cast %84 : vector<2x8xf32> to vector<2x8x1xf32>
    %86 = tpu.reciprocal %85 : vector<2x8x1xf32> -> vector<2x8x1xf32>
    %87 = vector.broadcast %86 : vector<2x8x1xf32> to vector<2x8x8xf32>
    %88 = arith.mulf %83, %87 : vector<2x8x8xf32>
    "tpu.trace_start"() <{level = 10 : i32, message = "bqk,bkd->bqd"}> : () -> ()
    %cst_32 = arith.constant dense<0.000000e+00> : vector<2x8x8xf32>
    %89 = tpu.matmul %88, %75, %cst_32 {dimension_numbers = #tpu.dot_dimension_numbers<[2], [1], [1], [2], [0, 0, 0, 1, 1, 2], [0], [0]>} : vector<2x8x8xf32>, vector<2x8x8xf32>, vector<2x8x8xf32> -> vector<2x8x8xf32>
    "tpu.trace_stop"() : () -> ()
    %90 = vector.shape_cast %89 : vector<2x8x8xf32> to vector<16x8xf32>
    %c24 = arith.constant 24 : index
    %c0_33 = arith.constant 0 : index
    %91 = vector.load %arg5[%c24, %c0_33] : memref<32x32xf32, #tpu.memory_space<vmem>>, vector<8x32xf32>
    %cst_34 = arith.constant dense<0.000000e+00> : vector<16x32xf32>
    %92 = tpu.matmul %90, %91, %cst_34 {dimension_numbers = #tpu.dot_dimension_numbers<[1], [0], [0], [1], [0, 0, 1, 1], [], []>} : vector<16x8xf32>, vector<8x32xf32>, vector<16x32xf32> -> vector<16x32xf32>
    %93 = arith.addf %72, %92 : vector<16x32xf32>
    %c0_35 = arith.constant 0 : index
    %c0_36 = arith.constant 0 : index
    %94 = vector.load %arg6[%c0_35, %c0_36] : memref<1x32xf32, #tpu.memory_space<vmem>>, vector<1x32xf32>
    %95 = vector.broadcast %94 : vector<1x32xf32> to vector<16x32xf32>
    %96 = arith.addf %93, %95 : vector<16x32xf32>
    %97 = vector.shape_cast %96 : vector<16x32xf32> to vector<2x8x32xf32>
    %c0_37 = arith.constant 0 : index
    %c0_38 = arith.constant 0 : index
    %c0_39 = arith.constant 0 : index
    %98 = vector.load %arg7[%c0_37, %c0_38, %c0_39] : memref<2x8x32xf32, #tpu.memory_space<vmem>>, vector<2x8x32xf32>
    tpu.vector_store %arg7[%c0_37, %c0_38, %c0_39], %97 {strides = array<i32>} : memref<2x8x32xf32, #tpu.memory_space<vmem>>, vector<2x8x32xf32>,
    return
  }
  func.func @transform_0(%arg0: i32) -> (i32, i32, i32) {
    %c0_i32 = arith.constant 0 : i32
    %c0_i32_0 = arith.constant 0 : i32
    %c0_i32_1 = arith.constant 0 : i32
    return %arg0, %c0_i32, %c0_i32_0 : i32, i32, i32
  }
  func.func @transform_1(%arg0: i32) -> (i32, i32, i32) {
    %c0_i32 = arith.constant 0 : i32
    %c0_i32_0 = arith.constant 0 : i32
    %c0_i32_1 = arith.constant 0 : i32
    %c0_i32_2 = arith.constant 0 : i32
    return %c0_i32, %c0_i32_0, %c0_i32_1 : i32, i32, i32
  }
  func.func @transform_2(%arg0: i32) -> (i32, i32) {
    %c0_i32 = arith.constant 0 : i32
    %c0_i32_0 = arith.constant 0 : i32
    %c0_i32_1 = arith.constant 0 : i32
    return %c0_i32, %c0_i32_0 : i32, i32
  }
  func.func @transform_3(%arg0: i32) -> (i32, i32) {
    %c0_i32 = arith.constant 0 : i32
    %c0_i32_0 = arith.constant 0 : i32
    %c0_i32_1 = arith.constant 0 : i32
    return %c0_i32, %c0_i32_0 : i32, i32
  }
  func.func @transform_4(%arg0: i32) -> (i32, i32) {
    %c0_i32 = arith.constant 0 : i32
    %c0_i32_0 = arith.constant 0 : i32
    %c0_i32_1 = arith.constant 0 : i32
    return %c0_i32, %c0_i32_0 : i32, i32
  }
  func.func @transform_5(%arg0: i32) -> (i32, i32) {
    %c0_i32 = arith.constant 0 : i32
    %c0_i32_0 = arith.constant 0 : i32
    %c0_i32_1 = arith.constant 0 : i32
    return %c0_i32, %c0_i32_0 : i32, i32
  }
  func.func @transform_6(%arg0: i32) -> (i32, i32, i32) {
    %c0_i32 = arith.constant 0 : i32
    %c0_i32_0 = arith.constant 0 : i32
    %c0_i32_1 = arith.constant 0 : i32
    return %arg0, %c0_i32, %c0_i32_0 : i32, i32, i32
  }
}

</mosaic_0001>

<bundles_post_ra>
// kernel: tpu_custom_call.1
= control target key start
LH: loop header
LB: loop body
LE: loop exit
PB: predicated region body
PF: predicated region fallthrough
CT: control target
= control target key end

     0   :  { %11 = vsyncpa [#allocation3], 0  ;;  %s2532_s0 = inlined_call_operand.hbm [shape: f32[2,8,32], index: 0, kind: input, shape index: {}]   ;;  %s2533_s1 = inlined_call_operand.hbm [shape: f32[1,8,8], index: 1, kind: input, shape index: {}]   ;;  %s2534_s2 = inlined_call_operand.hbm [shape: f32[32,96], index: 2, kind: input, shape index: {}]   ;;  %s2535_s3 = inlined_call_operand.vmem [shape: f32[1,96], index: 3, kind: input, shape index: {}]   ;;  %s2536_s4 = inlined_call_operand.hbm [shape: f32[32,32], index: 4, kind: input, shape index: {}]   ;;  %s2537_s5 = inlined_call_operand.vmem [shape: f32[1,32], index: 5, kind: input, shape index: {}]   ;;  %s2538_s6 = inlined_call_operand.hbm [shape: f32[2,8,32], index: 6, kind: output, shape index: {}]  }
   0x1   :  { %12 = vsyncpa [#allocation6], 0 }
   0x2   :  { %13 = vsyncpa [#allocation9], 0 }
   0x3   :  { %14 = vsyncpa [#allocation4], 0  ;;  %s2235_s21 = smov [#allocation5]   ;;  %s2236_s23 = smov [#allocation2]  }
   0x4   :  { %s33_s22 = sshll.u32 %s2235_s21, 4  ;;  %s20_s24 = sshll.u32 %s2236_s23, 4  ;;  %s34_s22 = int_to_ptr.vmem [resolvable:$true] %s33_s22  ;;  %s2290_s24 = int_to_ptr.vmem [resolvable:$true] %s20_s24 }
   0x5   :  { %s2117_s27 = scalar_lea.hbm %s2533_s1, 128 }
   0x6   :  { %p2118_p0 = scmp.ne.s32.totalorder %s2533_s1, %s2117_s27  ;;  %p2121_p1 = scmp.lt.u32.totalorder %s2117_s27, %s2533_s1 }
   0x8   :  { %p2123_p2 = pnand %p2121_p1, %p2118_p0 }
   0xa   :  { %2126 = shalt.err (!%p2123_p2)
}
   0xb   :  { %s2127_s8 = scalar_lea.vmem %s34_s22, 128  ;;  %p2132_p4 = scmp.lt.s32.totalorder %s34_s22, %s34_s22 }
   0xc   :  { %p2128_p3 = scmp.ne.s32.totalorder %s34_s22, %s2127_s8  ;;  %p2133_p5 = scmp.lt.s32.totalorder %s2127_s8, %s2127_s8 }
   0xe   :  { %p2134_p6 = por %p2133_p5, %p2132_p4 }
  0x10   :  { %p2135_p7 = pnand %p2134_p6, %p2128_p3 }
  0x12   :  { %2138 = shalt.err (!%p2135_p7)
}
  0x13   :  { %36 = dma.hbm_to_vmem [thread:$0]  %s2533_s1, 128, %s34_s22, [#allocation6]  }
  0x14   :  { %s2139_s13 = scalar_lea.hbm %s2532_s0, 256 }
  0x15   :  { %p2140_p8 = scmp.ne.s32.totalorder %s2532_s0, %s2139_s13  ;;  %p2143_p9 = scmp.lt.u32.totalorder %s2139_s13, %s2532_s0 }
  0x17   :  { %p2145_p10 = pnand %p2143_p9, %p2140_p8 }
  0x19   :  { %2148 = shalt.err (!%p2145_p10)
}
  0x1a   :  { %s2149_s18 = scalar_lea.vmem %s2290_s24, 256  ;;  %p2154_p12 = scmp.lt.s32.totalorder %s2290_s24, %s2290_s24 }
  0x1b   :  { %p2150_p11 = scmp.ne.s32.totalorder %s2290_s24, %s2149_s18  ;;  %p2155_p13 = scmp.lt.s32.totalorder %s2149_s18, %s2149_s18 }
  0x1d   :  { %p2156_p0 = por %p2155_p13, %p2154_p12 }
  0x1f   :  { %p2157_p1 = pnand %p2156_p0, %p2150_p11 }
  0x21   :  { %2160 = shalt.err (!%p2157_p1)
}
  0x22   :  { %s2237_s1 = smov 128   ;;  %s2238_s19 = smov 8  }
  0x23   :  { %26 = dma.hbm_to_vmem [thread:$0]  %s2532_s0, 256, %s2290_s24, [#allocation3], %s2237_s1, %s2237_s1, %s2238_s19  }
  0x24   :  { %s2239_s22 = smov [#allocation7]   ;;  %s2240_s25 = smov [#allocation8]  }
  0x25   :  { %s42_s23 = sshll.u32 %s2239_s22, 4  ;;  %s56_s26 = sshll.u32 %s2240_s25, 4  ;;  %s43_s23 = int_to_ptr.vmem [resolvable:$true] %s42_s23  ;;  %s2324_s26 = int_to_ptr.vmem [resolvable:$true] %s56_s26 }
  0x26   :  { %s2161_s29 = scalar_lea.hbm %s2534_s2, 512 }
  0x27   :  { %p2162_p2 = scmp.ne.s32.totalorder %s2534_s2, %s2161_s29  ;;  %p2165_p3 = scmp.lt.u32.totalorder %s2161_s29, %s2534_s2 }
  0x29   :  { %p2167_p4 = pnand %p2165_p3, %p2162_p2 }
  0x2b   :  { %2170 = shalt.err (!%p2167_p4)
}
  0x2c   :  { %s2171_s0 = scalar_lea.vmem %s43_s23, 512  ;;  %p2176_p6 = scmp.lt.s32.totalorder %s43_s23, %s43_s23 }
  0x2d   :  { %p2172_p5 = scmp.ne.s32.totalorder %s43_s23, %s2171_s0  ;;  %p2177_p7 = scmp.lt.s32.totalorder %s2171_s0, %s2171_s0 }
  0x2f   :  { %p2178_p8 = por %p2177_p7, %p2176_p6 }
  0x31   :  { %p2179_p9 = pnand %p2178_p8, %p2172_p5 }
  0x33   :  { %2182 = shalt.err (!%p2179_p9)
}
  0x34   :  { %48 = dma.hbm_to_vmem [thread:$0]  %s2534_s2, 512, %s43_s23, [#allocation6], %s2237_s1, %s2237_s1, %s2238_s19  }
  0x35   :  { %s2183_s13 = scalar_lea.hbm %s2536_s4, 512 }
  0x36   :  { %p2184_p10 = scmp.ne.s32.totalorder %s2536_s4, %s2183_s13  ;;  %p2187_p11 = scmp.lt.u32.totalorder %s2183_s13, %s2536_s4 }
  0x38   :  { %p2189_p12 = pnand %p2187_p11, %p2184_p10 }
  0x3a   :  { %2192 = shalt.err (!%p2189_p12)
}
  0x3b   :  { %s2193_s18 = scalar_lea.vmem %s2324_s26, 512  ;;  %p2198_p0 = scmp.lt.s32.totalorder %s2324_s26, %s2324_s26 }
  0x3c   :  { %p2194_p13 = scmp.ne.s32.totalorder %s2324_s26, %s2193_s18  ;;  %p2199_p1 = scmp.lt.s32.totalorder %s2193_s18, %s2193_s18 }
  0x3e   :  { %p2200_p2 = por %p2199_p1, %p2198_p0 }
  0x40   :  { %p2201_p3 = pnand %p2200_p2, %p2194_p13 }
  0x42   :  { %2204 = shalt.err (!%p2201_p3)
}
  0x43   :  { %62 = dma.hbm_to_vmem [thread:$0]  %s2536_s4, 512, %s2324_s26, [#allocation9], %s2237_s1, %s2237_s1, %s2238_s19  }
  0x44   :  { %2227 = dma.done.wait [#allocation3], 256  }
  0x45   :  { %2228 = vsyncadd [#allocation3], 4294967040 }
  0x46   :  { %2229 = dma.done.wait [#allocation6], 640  }
  0x47   :  { %2230 = vsyncadd [#allocation6], 4294966656 }
  0x48   :  { %2231 = dma.done.wait [#allocation9], 512  }
  0x49   :  { %2232 = vsyncadd [#allocation9], 4294966784  ;;  %vm90_vm0 = vcmask 261120   ;;  %v79_v0 = vld [vmem:[#allocation7] sm:$0xff]  ;;  %v80_v1 = vld [vmem:[#allocation7 + $0x8] sm:$0xff]  ;;  %v2241_v8 = vmov 0.0  }
  0x4a   :  { %v81_v2 = vld [vmem:[#allocation7 + $0x10] sm:$0xff]  ;;  %v2051_v3 = vpack.c.bf16 %v80_v1, %v79_v0  ;;  %v82_v4 = vld [vmem:[#allocation7 + $0x18] sm:$0xff]  ;;  %v77_v5 = vld [vmem:[#allocation2] sm:$0xff]  ;;  %1951 = vmatprep.subr.mxu1 %v2241_v8  ;;  %vm2242_vm1 = vmmov 0   ;;  %s2243_s22 = smov 96   ;;  %vm176_vm2 = vcmask 64512  }
  0x4b   :  { %v2055_v6 = vpack.c.bf16 %v82_v4, %v81_v2  ;;  %1948 = vmatprep.mubr.msk.f32.mxu0 %vm90_vm0, %v77_v5  ;;  %v78_v7 = vld [vmem:[#allocation2 + $0x8] sm:$0xff]  ;;  %1953 = vmatprep.mubr.msk.f32.mxu1 %vm2242_vm1, %v2241_v8  ;;  %v1854_v9 = vld [vmem:[%s2535_s3] ss:$0 sm:$0xff]  ;;  %v2390_v16 = vld [vmem:[#allocation5] sm:$0xff]  ;;  %s2244_s3 = smov 64   ;;  %s2245_s23 = smov 88  }
  0x4c   :  { %2052 = vmatprep.subr.bf16.mxu0 %v2051_v3  ;;  %s2246_s25 = smov 120   ;;  %s2247_s26 = smov 56  }
  0x4d   :  { %2054 = vmatpush3.bf16.msra.mxu0 %v2051_v3  ;;  %s2248_s27 = smov 112   ;;  %s2249_s28 = smov 80  }
  0x4e   :  { %2056 = vmatprep.subr.bf16.mxu0 %v2055_v6  ;;  %s2250_s29 = smov 48   ;;  %s2251_s30 = smov 72  }
  0x4f   :  { %s2252_s7 = smov 104   ;;  %s2253_s8 = smov 40  }
  0x50   :  { %s2254_s24 = smov [#allocation10]  }
  0x51   :  { %2058 = vmatpush3.bf16.msra.mxu0 %v2055_v6  ;;  %s1840_s10 = sshll.u32 %s2254_s24, 4  ;;  %s1841_s10 = int_to_ptr.vmem [resolvable:$true] %s1840_s10 }
  0x52   :  { %1971 = vmatprep.subr.mxu0 %v2241_v8  ;;  %s2205_s11 = scalar_lea.vmem %s1841_s10, 256  ;;  %p2210_p5 = scmp.lt.s32.totalorder %s1841_s10, %s1841_s10 }
  0x53   :  { %p2206_p4 = scmp.ne.s32.totalorder %s1841_s10, %s2205_s11  ;;  %p2211_p6 = scmp.lt.s32.totalorder %s2205_s11, %s2205_s11 }
  0x54   :  { %1949 = vmatmul.mubr.msk.f32.vlgmr.msra.gmra.mrb[0].mxu0 %vm90_vm0, %v78_v7 }
  0x55   :  { %1973 = vmatprep.mubr.msk.f32.mxu0 %vm2242_vm1, %v2241_v8  ;;  %p2212_p7 = por %p2211_p6, %p2210_p5 }
  0x57   :  { %p2213_p8 = pnand %p2212_p7, %p2206_p4 }
 0x127   :  { %v1950_v10 = vpop.f32.mrb[0].mxu0 }
 0x128   :  { %v163_v11 = vpop.f32.mrb[1].mxu0  ;;  %v2375_v13 = vadd.f32 %v1950_v10, %v1854_v9 }
 0x129   :  { %v2372_v12 = vadd.f32 %v1854_v9, %v163_v11 }
 0x12b   :  { %174 = vrot.lane.b32.xlu0 %v2372_v12, %s2243_s22 }
 0x12f   :  { %252 = vrot.lane.b32.xlu0 %v2375_v13, %s2243_s22 }
 0x19d   :  { %v175_v14 = vpop.permute.xlu0 %174 }
 0x19e   :  { %1952 = vmatpush3.xpose.msk.msra.mxu1 %vm176_vm2, %v175_v14 }
 0x19f   :  { %1956 = vmatprep.subr.mxu1 %v2241_v8 }
 0x1a1   :  { %1954 = vmatmul.mubr.msk.f32.vlgmr.msra.gmra.mrb[0].mxu1 %vm176_vm2, %v2372_v12  ;;  %v253_v15 = vpop.permute.xlu0 %252 }
 0x1a2   :  { %1957 = vmatpush3.xpose.msk.msra.mxu1 %vm176_vm2, %v253_v15  ;;  %1958 = vmatprep.mubr.msk.f32.mxu1 %vm2242_vm1, %v2241_v8 }
 0x1a3   :  { %1961 = vmatprep.subr.mxu1 %v2241_v8 }
 0x1a5   :  { %1959 = vmatmul.mubr.msk.f32.vlgmr.msra.gmra.mrb[2].mxu1 %vm176_vm2, %v2375_v13 }
 0x1a6   :  { %1963 = vmatprep.mubr.msk.f32.mxu1 %vm2242_vm1, %v2241_v8 }
 0x274   :  { %v247_v17 = vpop.f32.mrb[0].mxu1 }
 0x275   :  { %v248_v18 = vadd.f32 %v247_v17, %v2390_v16  ;;  %v1955_v19 = vpop.f32.mrb[1].mxu1 }
 0x277   :  { %v328_v20 = vsel %vm176_vm2, %v248_v18, -inf }
 0x278   :  { %329 = vmax.xlane.f32.xlu1 %v328_v20  ;;  %v324_v21 = vpop.f32.mrb[2].mxu1 }
 0x279   :  { %v325_v22 = vadd.f32 %v324_v21, %v2390_v16  ;;  %v1960_v23 = vpop.f32.mrb[3].mxu1 }
 0x27a   :  { %v502_v23 = vld [vmem:[#allocation8] sm:$0xff] }
 0x27b   :  { %v331_v24 = vsel %vm176_vm2, %v325_v22, -inf }
 0x27c   :  { %332 = vmax.xlane.f32.xlu1 %v331_v24 }
 0x28d   :  { %350 = vrot.lane.b32.xlu1 %v2372_v12, %s2244_s3 }
 0x291   :  { %426 = vrot.lane.b32.xlu1 %v2375_v13, %s2244_s3 }
 0x295   :  { %583 = vrot.lane.b32.xlu1 %v2375_v13, %s2245_s23 }
 0x305   :  { %v330_v25 = vpop.xlane.xlu1 %329 }
 0x306   :  { %v334_v26 = vsub.f32 %v248_v18, %v330_v25 }
 0x308   :  { %v336_v27 = vmul.f32 1.442695, %v334_v26 }
 0x309   :  { %v333_v28 = vpop.xlane.xlu1 %332 }
 0x30a   :  { %2085 = vpow2.f32 %v336_v27  ;;  %v335_v29 = vsub.f32 %v325_v22, %v333_v28  ;;  %v833_v22 = vld [vmem:[#allocation8 + $0x8] sm:$0xff] }
 0x30c   :  { %v338_v30 = vmul.f32 1.442695, %v335_v29 }
 0x30d   :  { %v351_v31 = vpop.permute.xlu1 %350 }
 0x30e   :  { %2087 = vpow2.f32 %v338_v30  ;;  %1962 = vmatpush3.msra.mxu1 %v351_v31 }
 0x30f   :  { %1966 = vmatprep.subr.mxu1 %v2241_v8 }
 0x311   :  { %v427_v36 = vpop.permute.xlu1 %426 }
 0x314   :  { %v2086_v32 = vpop.eup %2085 }
 0x315   :  { %v340_v33 = vsel %vm176_vm2, %v2086_v32, 0.0  ;;  %v584_v37 = vpop.permute.xlu1 %583 }
 0x316   :  { %341 = vadd.xlane.f32.xlu0 %v340_v33 }
 0x318   :  { %v2088_v34 = vpop.eup %2087 }
 0x319   :  { %v343_v35 = vsel %vm176_vm2, %v2088_v34, 0.0 }
 0x31a   :  { %344 = vadd.xlane.f32.xlu1 %v343_v35 }
 0x32b   :  { %581 = vrot.lane.b32.xlu1 %v2375_v13, %s2246_s25 }
 0x32c   :  { %505 = vrot.lane.b32.xlu0 %v2372_v12, %s2245_s23 }
 0x32f   :  { %503 = vrot.lane.b32.xlu1 %v2372_v12, %s2246_s25 }
 0x3a3   :  { %v342_v38 = vpop.xlane.xlu0 %341 }
 0x3a4   :  { %2089 = vrcp.f32 %v342_v38 }
 0x3a7   :  { %v345_v39 = vpop.xlane.xlu1 %344  ;;  %v506_v40 = vpop.permute.xlu0 %505 }
 0x3a8   :  { %2091 = vrcp.f32 %v345_v39  ;;  %1972 = vmatpush3.xpose.msk.msra.mxu0 %vm176_vm2, %v506_v40 }
 0x3a9   :  { %1981 = vmatprep.subr.mxu0 %v2241_v8 }
 0x3ab   :  { %v582_v41 = vpop.permute.xlu1 %581 }
 0x3ae   :  { %v2090_v42 = vpop.eup %2089 }
 0x3af   :  { %v348_v43 = vmul.f32 %v2090_v42, %v2086_v32  ;;  %v504_v44 = vpop.permute.xlu1 %503 }
 0x3b0   :  { %1974 = vmatmul.mubr.msk.f32.vlgmr.msra.gmra.mrb[2].mxu0 %vm176_vm2, %v504_v44 }
 0x3b1   :  { %1964 = vmatmul.mubr.msk.f32.vlgmr.msra.gmra.mrb[4].mxu1 %vm176_vm2, %v348_v43  ;;  %1983 = vmatprep.mubr.msk.f32.mxu0 %vm2242_vm1, %v2241_v8 }
 0x3b2   :  { %v2092_v45 = vpop.eup %2091  ;;  %1967 = vmatpush3.msra.mxu1 %v427_v36  ;;  %1968 = vmatprep.mubr.msk.f32.mxu1 %vm2242_vm1, %v2241_v8 }
 0x3b3   :  { %v349_v46 = vmul.f32 %v2092_v45, %v2088_v34  ;;  %1976 = vmatprep.subr.mxu1 %v2241_v8 }
 0x3b5   :  { %1969 = vmatmul.mubr.msk.f32.vlgmr.msra.gmra.mrb[6].mxu1 %vm176_vm2, %v349_v46 }
 0x3b6   :  { %1978 = vmatprep.mubr.msk.f32.mxu1 %vm2242_vm1, %v2241_v8 }
 0x3b9   :  { %1977 = vmatpush3.xpose.msk.msra.mxu1 %vm176_vm2, %v584_v37 }
 0x3ba   :  { %1986 = vmatprep.subr.mxu1 %v2241_v8 }
 0x3bc   :  { %1979 = vmatmul.mubr.msk.f32.vlgmr.msra.gmra.mrb[8].mxu1 %vm176_vm2, %v582_v41 }
 0x3bd   :  { %1988 = vmatprep.mubr.msk.f32.mxu1 %vm2242_vm1, %v2241_v8 }
 0x483   :  { %v577_v47 = vpop.f32.mrb[2].mxu0 }
 0x484   :  { %v2422_v48 = vpop.f32.mrb[4].mxu1  ;;  %v1975_v49 = vpop.f32.mrb[3].mxu0  ;;  %v578_v57 = vadd.f32 %v577_v47, %v2390_v16 }
 0x485   :  { %v1965_v50 = vpop.f32.mrb[5].mxu1 }
 0x486   :  { %v659_v58 = vsel %vm176_vm2, %v578_v57, -inf }
 0x488   :  { %v2424_v51 = vpop.f32.mrb[6].mxu1 }
 0x489   :  { %v1970_v52 = vpop.f32.mrb[7].mxu1 }
 0x48f   :  { %v655_v53 = vpop.f32.mrb[8].mxu1 }
 0x490   :  { %v656_v54 = vadd.f32 %v655_v53, %v2390_v16  ;;  %v1980_v55 = vpop.f32.mrb[9].mxu1 }
 0x492   :  { %v662_v56 = vsel %vm176_vm2, %v656_v54, -inf }
 0x493   :  { %663 = vmax.xlane.f32.xlu1 %v662_v56 }
 0x4a4   :  { %757 = vrot.lane.b32.xlu1 %v2375_v13, %s2247_s26 }
 0x4a8   :  { %996 = vrot.lane.b32.xlu1 %v2372_v12, %s2248_s27 }
 0x4ac   :  { %1076 = vrot.lane.b32.xlu1 %v2375_v13, %s2249_s28 }
 0x4b0   :  { %1074 = vrot.lane.b32.xlu1 %v2375_v13, %s2248_s27 }
 0x4d4   :  { %660 = vmax.xlane.f32.xlu1 %v659_v58 }
 0x520   :  { %v664_v59 = vpop.xlane.xlu1 %663 }
 0x521   :  { %v666_v60 = vsub.f32 %v656_v54, %v664_v59 }
 0x523   :  { %v669_v61 = vmul.f32 1.442695, %v666_v60 }
 0x524   :  { %v758_v62 = vpop.permute.xlu1 %757 }
 0x525   :  { %2093 = vpow2.f32 %v669_v61  ;;  %1987 = vmatpush3.msra.mxu1 %v758_v62 }
 0x526   :  { %2001 = vmatprep.subr.mxu1 %v2241_v8 }
 0x528   :  { %v997_v1 = vpop.permute.xlu1 %996 }
 0x52c   :  { %v1077_v2 = vpop.permute.xlu1 %1076 }
 0x52f   :  { %v2094_v63 = vpop.eup %2093 }
 0x530   :  { %v674_v0 = vsel %vm176_vm2, %v2094_v63, 0.0  ;;  %v1075_v3 = vpop.permute.xlu1 %1074 }
 0x531   :  { %675 = vadd.xlane.f32.xlu0 %v674_v0 }
 0x547   :  { %998 = vrot.lane.b32.xlu0 %v2372_v12, %s2249_s28 }
 0x561   :  { %v661_v4 = vpop.xlane.xlu1 %660 }
 0x562   :  { %v665_v5 = vsub.f32 %v578_v57, %v661_v4 }
 0x564   :  { %v667_v6 = vmul.f32 1.442695, %v665_v5 }
 0x566   :  { %2095 = vpow2.f32 %v667_v6 }
 0x570   :  { %v2096_v7 = vpop.eup %2095 }
 0x571   :  { %v671_v9 = vsel %vm176_vm2, %v2096_v7, 0.0 }
 0x572   :  { %672 = vadd.xlane.f32.xlu0 %v671_v9 }
 0x588   :  { %681 = vrot.lane.b32.xlu0 %v2372_v12, %s2247_s26 }
 0x58c   :  { %1250 = vrot.lane.b32.xlu0 %v2375_v13, %s2250_s29 }
 0x590   :  { %1412 = vrot.lane.b32.xlu0 %v2372_v12, %s2251_s30 }
 0x594   :  { %1490 = vrot.lane.b32.xlu0 %v2375_v13, %s2251_s30 }
 0x598   :  { %1410 = vrot.lane.b32.xlu0 %v2372_v12, %s2252_s7 }
 0x5be   :  { %v676_v10 = vpop.xlane.xlu0 %675 }
 0x5bf   :  { %2097 = vrcp.f32 %v676_v10 }
 0x5c2   :  { %v999_v15 = vpop.permute.xlu0 %998 }
 0x5c9   :  { %v2098_v11 = vpop.eup %2097 }
 0x5ca   :  { %v680_v14 = vmul.f32 %v2098_v11, %v2094_v63 }
 0x5cc   :  { %1989 = vmatmul.mubr.msk.f32.vlgmr.msra.gmra.mrb[10].mxu1 %vm176_vm2, %v680_v14 }
 0x5cd   :  { %2002 = vmatpush3.xpose.msk.msra.mxu1 %vm176_vm2, %v999_v15  ;;  %2003 = vmatprep.mubr.msk.f32.mxu1 %vm2242_vm1, %v2241_v8 }
 0x5ce   :  { %2006 = vmatprep.subr.mxu1 %v2241_v8 }
 0x5d0   :  { %2004 = vmatmul.mubr.msk.f32.vlgmr.msra.gmra.mrb[12].mxu1 %vm176_vm2, %v997_v1 }
 0x5d1   :  { %2007 = vmatpush3.xpose.msk.msra.mxu1 %vm176_vm2, %v1077_v2  ;;  %2008 = vmatprep.mubr.msk.f32.mxu1 %vm2242_vm1, %v2241_v8 }
 0x5d2   :  { %2016 = vmatprep.subr.mxu1 %v2241_v8 }
 0x5d4   :  { %2009 = vmatmul.mubr.msk.f32.vlgmr.msra.gmra.mrb[14].mxu1 %vm176_vm2, %v1075_v3 }
 0x5d5   :  { %2018 = vmatprep.mubr.msk.f32.mxu1 %vm2242_vm1, %v2241_v8 }
 0x5ff   :  { %v673_v17 = vpop.xlane.xlu0 %672 }
 0x600   :  { %2099 = vrcp.f32 %v673_v17 }
 0x603   :  { %v682_v18 = vpop.permute.xlu0 %681 }
 0x604   :  { %1982 = vmatpush3.msra.mxu0 %v682_v18 }
 0x605   :  { %1991 = vmatprep.subr.mxu0 %v833_v22 }
 0x607   :  { %v1251_v19 = vpop.permute.xlu0 %1250 }
 0x608   :  { %2017 = vmatpush3.msra.mxu1 %v1251_v19 }
 0x609   :  { %2026 = vmatprep.subr.mxu1 %v2241_v8 }
 0x60a   :  { %v2100_v20 = vpop.eup %2099 }
 0x60b   :  { %v679_v21 = vmul.f32 %v2100_v20, %v2096_v7  ;;  %v1413_v50 = vpop.permute.xlu0 %1412 }
 0x60d   :  { %1984 = vmatmul.mubr.msk.f32.vlgmr.msra.gmra.mrb[4].mxu0 %vm176_vm2, %v679_v21 }
 0x60e   :  { %1992 = vmatpush3.msra.mxu0 %v833_v22 }
 0x60f   :  { %1996 = vmatprep.subr.mxu0 %v502_v23  ;;  %v1491_v54 = vpop.permute.xlu0 %1490 }
 0x613   :  { %v1411_v56 = vpop.permute.xlu0 %1410 }
 0x69f   :  { %v829_v24 = vpop.f32.mrb[10].mxu1 }
 0x6a0   :  { %v1990_v25 = vpop.f32.mrb[11].mxu1 }
 0x6a3   :  { %v1070_v26 = vpop.f32.mrb[12].mxu1 }
 0x6a4   :  { %v1071_v27 = vadd.f32 %v1070_v26, %v2390_v16  ;;  %v2005_v28 = vpop.f32.mrb[13].mxu1 }
 0x6a6   :  { %v1152_v29 = vsel %vm176_vm2, %v1071_v27, -inf }
 0x6a7   :  { %1153 = vmax.xlane.f32.xlu1 %v1152_v29  ;;  %v1148_v30 = vpop.f32.mrb[14].mxu1 }
 0x6a8   :  { %v1149_v31 = vadd.f32 %v1148_v30, %v2390_v16  ;;  %v2010_v32 = vpop.f32.mrb[15].mxu1 }
 0x6aa   :  { %v1155_v33 = vsel %vm176_vm2, %v1149_v31, -inf }
 0x6ab   :  { %1156 = vmax.xlane.f32.xlu1 %v1155_v33 }
 0x6e0   :  { %v753_v34 = vpop.f32.mrb[4].mxu0 }
 0x6e1   :  { %v1985_v35 = vpop.f32.mrb[5].mxu0  ;;  %1993 = vmatprep.mubr.msk.f32.mxu0 %vm176_vm2, %v753_v34 }
 0x6e2   :  { %1994 = vmatmul.mubr.msk.f32.vlgmr.msra.gmra.mrb[6].mxu0 %vm176_vm2, %v829_v24 }
 0x6e3   :  { %1998 = vmatprep.mubr.msk.f32.mxu0 %vm176_vm2, %v2422_v48  ;;  %1997 = vmatpush3.msra.mxu0 %v502_v23  ;;  %v1326_v48 = vld [vmem:[#allocation8 + $0x10] sm:$0xff] }
 0x6e4   :  { %2011 = vmatprep.subr.mxu0 %v2241_v8 }
 0x6ea   :  { %1999 = vmatmul.mubr.msk.f32.vlgmr.msra.gmra.mrb[6].mxu0 %vm176_vm2, %v2424_v51 }
 0x6eb   :  { %2013 = vmatprep.mubr.msk.f32.mxu0 %vm2242_vm1, %v2241_v8 }
 0x734   :  { %v1154_v36 = vpop.xlane.xlu1 %1153 }
 0x735   :  { %v1158_v37 = vsub.f32 %v1071_v27, %v1154_v36 }
 0x737   :  { %v1160_v38 = vmul.f32 1.442695, %v1158_v37 }
 0x738   :  { %v1157_v39 = vpop.xlane.xlu1 %1156 }
 0x739   :  { %2101 = vpow2.f32 %v1160_v38  ;;  %v1159_v40 = vsub.f32 %v1149_v31, %v1157_v39 }
 0x73b   :  { %v1162_v41 = vmul.f32 1.442695, %v1159_v40 }
 0x73d   :  { %2103 = vpow2.f32 %v1162_v41 }
 0x743   :  { %v2102_v42 = vpop.eup %2101 }
 0x744   :  { %v1164_v43 = vsel %vm176_vm2, %v2102_v42, 0.0 }
 0x745   :  { %1165 = vadd.xlane.f32.xlu1 %v1164_v43 }
 0x747   :  { %v2104_v44 = vpop.eup %2103 }
 0x748   :  { %v1167_v45 = vsel %vm176_vm2, %v2104_v44, 0.0 }
 0x749   :  { %1168 = vadd.xlane.f32.xlu1 %v1167_v45 }
 0x75a   :  { %1174 = vrot.lane.b32.xlu1 %v2372_v12, %s2250_s29 }
 0x75e   :  { %1488 = vrot.lane.b32.xlu1 %v2375_v13, %s2252_s7 }
 0x7d2   :  { %v1166_v46 = vpop.xlane.xlu1 %1165 }
 0x7d3   :  { %2105 = vrcp.f32 %v1166_v46 }
 0x7d6   :  { %v1169_v47 = vpop.xlane.xlu1 %1168 }
 0x7d7   :  { %2107 = vrcp.f32 %v1169_v47 }
 0x7da   :  { %v1175_v49 = vpop.permute.xlu1 %1174 }
 0x7db   :  { %2012 = vmatpush3.msra.mxu0 %v1175_v49 }
 0x7dc   :  { %2021 = vmatprep.subr.mxu0 %v1326_v48 }
 0x7dd   :  { %v2106_v51 = vpop.eup %2105 }
 0x7de   :  { %v1172_v52 = vmul.f32 %v2106_v51, %v2102_v42  ;;  %v1489_v61 = vpop.permute.xlu1 %1488 }
 0x7e0   :  { %2014 = vmatmul.mubr.msk.f32.vlgmr.msra.gmra.mrb[8].mxu0 %vm176_vm2, %v1172_v52 }
 0x7e1   :  { %v2108_v53 = vpop.eup %2107  ;;  %2022 = vmatpush3.msra.mxu0 %v1326_v48 }
 0x7e2   :  { %v1173_v55 = vmul.f32 %v2108_v53, %v2104_v44  ;;  %2031 = vmatprep.subr.mxu0 %v2241_v8 }
 0x7e4   :  { %2019 = vmatmul.mubr.msk.f32.vlgmr.msra.gmra.mrb[16].mxu1 %vm176_vm2, %v1173_v55 }
 0x7e5   :  { %2027 = vmatpush3.xpose.msk.msra.mxu1 %vm176_vm2, %v1413_v50  ;;  %2028 = vmatprep.mubr.msk.f32.mxu1 %vm2242_vm1, %v2241_v8 }
 0x7e6   :  { %2036 = vmatprep.subr.mxu1 %v2241_v8 }
 0x7e8   :  { %2029 = vmatmul.mubr.msk.f32.vlgmr.msra.gmra.mrb[18].mxu1 %vm176_vm2, %v1411_v56 }
 0x7e9   :  { %2038 = vmatprep.mubr.msk.f32.mxu1 %vm2242_vm1, %v2241_v8 }
 0x8b3   :  { %v1246_v57 = vpop.f32.mrb[8].mxu0 }
 0x8b4   :  { %v2015_v58 = vpop.f32.mrb[9].mxu0  ;;  %2023 = vmatprep.mubr.msk.f32.mxu0 %vm176_vm2, %v1246_v57 }
 0x8b7   :  { %v1322_v59 = vpop.f32.mrb[16].mxu1 }
 0x8b8   :  { %v2020_v60 = vpop.f32.mrb[17].mxu1  ;;  %2024 = vmatmul.mubr.msk.f32.vlgmr.msra.gmra.mrb[6].mxu0 %vm176_vm2, %v1322_v59 }
 0x8b9   :  { %2032 = vmatpush3.xpose.msk.msra.mxu0 %vm176_vm2, %v1491_v54  ;;  %2033 = vmatprep.mubr.msk.f32.mxu0 %vm2242_vm1, %v2241_v8 }
 0x8ba   :  { %2041 = vmatprep.subr.mxu0 %v2241_v8 }
 0x8bb   :  { %v1484_v62 = vpop.f32.mrb[18].mxu1 }
 0x8bc   :  { %v1485_v63 = vadd.f32 %v1484_v62, %v2390_v16  ;;  %v2030_v0 = vpop.f32.mrb[19].mxu1  ;;  %2034 = vmatmul.mubr.msk.f32.vlgmr.msra.gmra.mrb[10].mxu0 %vm176_vm2, %v1489_v61 }
 0x8bd   :  { %2043 = vmatprep.mubr.msk.f32.mxu0 %vm2242_vm1, %v2241_v8 }
 0x8be   :  { %v1566_v1 = vsel %vm176_vm2, %v1485_v63, -inf }
 0x8bf   :  { %1567 = vmax.xlane.f32.xlu0 %v1566_v1 }
 0x94c   :  { %v1568_v2 = vpop.xlane.xlu0 %1567 }
 0x94d   :  { %v1572_v3 = vsub.f32 %v1485_v63, %v1568_v2 }
 0x94f   :  { %v1574_v4 = vmul.f32 1.442695, %v1572_v3 }
 0x951   :  { %2109 = vpow2.f32 %v1574_v4 }
 0x95b   :  { %v2110_v5 = vpop.eup %2109 }
 0x95c   :  { %v1578_v6 = vsel %vm176_vm2, %v2110_v5, 0.0 }
 0x95d   :  { %1579 = vadd.xlane.f32.xlu0 %v1578_v6 }
 0x98f   :  { %v1562_v7 = vpop.f32.mrb[10].mxu0 }
 0x990   :  { %v1563_v9 = vadd.f32 %v1562_v7, %v2390_v16  ;;  %v2035_v10 = vpop.f32.mrb[11].mxu0 }
 0x992   :  { %v1569_v11 = vsel %vm176_vm2, %v1563_v9, -inf }
 0x993   :  { %1570 = vmax.xlane.f32.xlu1 %v1569_v11 }
 0x9a4   :  { %1588 = vrot.lane.b32.xlu1 %v2372_v12, %s2253_s8  ;;  %v1740_v12 = vld [vmem:[#allocation8 + $0x18] sm:$0xff] }
 0x9ea   :  { %v1580_v8 = vpop.xlane.xlu0 %1579 }
 0x9eb   :  { %2111 = vrcp.f32 %v1580_v8 }
 0x9f5   :  { %v2112_v15 = vpop.eup %2111 }
 0x9f6   :  { %v1586_v19 = vmul.f32 %v2112_v15, %v2110_v5 }
 0xa20   :  { %v1571_v14 = vpop.xlane.xlu1 %1570 }
 0xa21   :  { %v1573_v17 = vsub.f32 %v1563_v9, %v1571_v14 }
 0xa23   :  { %v1576_v18 = vmul.f32 1.442695, %v1573_v17 }
 0xa24   :  { %v1589_v20 = vpop.permute.xlu1 %1588 }
 0xa25   :  { %2113 = vpow2.f32 %v1576_v18  ;;  %2037 = vmatpush3.msra.mxu1 %v1589_v20 }
 0xa26   :  { %2039 = vmatmul.mubr.msk.f32.vlgmr.msra.gmra.mrb[20].mxu1 %vm176_vm2, %v1586_v19 }
 0xa2f   :  { %v2114_v16 = vpop.eup %2113 }
 0xa30   :  { %v1581_v21 = vsel %vm176_vm2, %v2114_v16, 0.0 }
 0xa31   :  { %1582 = vadd.xlane.f32.xlu0 %v1581_v21 }
 0xa47   :  { %1664 = vrot.lane.b32.xlu0 %v2375_v13, %s2253_s8  ;;  %v1889_v13 = vld [vmem:[%s2537_s5] ss:$0 sm:$0xff] }
 0xabe   :  { %v1583_v22 = vpop.xlane.xlu0 %1582 }
 0xabf   :  { %2115 = vrcp.f32 %v1583_v22 }
 0xac2   :  { %v1665_v23 = vpop.permute.xlu0 %1664 }
 0xac3   :  { %2042 = vmatpush3.msra.mxu0 %v1665_v23 }
 0xac4   :  { %2046 = vmatprep.subr.mxu0 %v1740_v12 }
 0xac9   :  { %v2116_v24 = vpop.eup %2115 }
 0xaca   :  { %v1587_v25 = vmul.f32 %v2116_v24, %v2114_v16 }
 0xacc   :  { %2044 = vmatmul.mubr.msk.f32.vlgmr.msra.gmra.mrb[12].mxu0 %vm176_vm2, %v1587_v25 }
 0xacd   :  { %2047 = vmatpush3.msra.mxu0 %v1740_v12 }
 0xaf9   :  { %v1660_v26 = vpop.f32.mrb[20].mxu1 }
 0xafa   :  { %v2040_v27 = vpop.f32.mrb[21].mxu1  ;;  %2048 = vmatprep.mubr.msk.f32.mxu0 %vm176_vm2, %v1660_v26 }
 0xb9f   :  { %v1736_v28 = vpop.f32.mrb[12].mxu0 }
 0xba0   :  { %v2045_v29 = vpop.f32.mrb[13].mxu0  ;;  %2049 = vmatmul.mubr.msk.f32.vlgmr.msra.gmra.mrb[6].mxu0 %vm176_vm2, %v1736_v28 }
 0xc73   :  { %v2050_v30 = vpop.f32.mrb[6].mxu0 }
 0xc74   :  { %v1832_v31 = vadd.f32 %v2050_v30, %v1889_v13  ;;  %v1813_v32 = vpop.f32.mrb[7].mxu0 }
 0xc75   :  { %v1831_v33 = vadd.f32 %v1889_v13, %v1813_v32 }
 0xc76   :  { %1834 = vst.msk [vmem:[#allocation10 + $0x8] sm:$0xff] %vm90_vm0, %v1832_v31 }
 0xc77   :  { %1833 = vst.msk [vmem:[#allocation10] sm:$0xff] %vm90_vm0, %v1831_v33 }
 0xc78   :  { %2216 = shalt.err (!%p2213_p8)
}
 0xc79   :  { %s2217_s13 = scalar_lea.hbm %s2538_s6, 256 }
 0xc7a   :  { %p2218_p9 = scmp.ne.s32.totalorder %s2538_s6, %s2217_s13  ;;  %p2221_p10 = scmp.lt.u32.totalorder %s2217_s13, %s2538_s6 }
 0xc7c   :  { %p2223_p11 = pnand %p2221_p10, %p2218_p9 }
 0xc7e   :  { %2226 = shalt.err (!%p2223_p11)
}
 0xc7f   :  { %1846 = dma.vmem_to_hbm [thread:$0]  %s1841_s10, 256, %s2538_s6, [#allocation4], %s2237_s1, %s2237_s1, %s2238_s19  }
 0xc80   :  { %2233 = dma.done.wait [#allocation4], 256  }
 0xc81   :  { %2234 = vsyncadd [#allocation4], 4294967040 }
 0xc82   :  { %1850 = vsyncpa [#allocation3], 1 }
 0xc83   :  { %1851 = vsyncpa [#allocation6], 1 }
 0xc84   :  { %1852 = vsyncpa [#allocation9], 1 }
 0xc85   :  { %1853 = vsyncpa [#allocation4], 1 }

</bundles_post_ra>
